<compile_context>
chip_gen: v6e
topology: v6e:2x2x1
jax: 0.10.0
libtpu: 0.0.40
codegen_flags: <defaults>
</compile_context>

<pallas_src>
import jax
import jax.numpy as jnp
from jax.experimental import pallas as pl
from jax.experimental.pallas import tpu as pltpu

MAX_LANE_WIDTH = 2048          # largest candidate last-dim (multiple of 128)
TARGET_TILE_BYTES = 4 << 20    # ~4 MiB per pipeline buffer
VMEM_LIMIT_BYTES = 32 << 20    # explicit scoped-VMEM limit, safe on v5e/v6e/v7x
MIN_GRID_STEPS = 4             # keep >=4 steps so v7x's 2 TCs both stream data


def _cdiv(a, b):
    return -(-a // b)


def _round_up(a, b):
    return _cdiv(a, b) * b


def _pick_lane_width(n):
    """Largest multiple of 128 (<= MAX_LANE_WIDTH) that divides n, else None."""
    start = (min(MAX_LANE_WIDTH, n) // 128) * 128
    for c in range(start, 127, -128):
        if n % c == 0:
            return c
    return None


def _vdp_kernel(mu_ref, u_ref, o_ref):
    # mu_ref: SMEM scalar (1,); u_ref/o_ref: (tr, C) VMEM tiles.
    mu = mu_ref[0]
    u = u_ref[...]
    # Explicit cast keeps the kernel dtype-generic (e.g. bf16 U with f32 mu).
    o_ref[...] = (-mu * (1.0 - u * u)).astype(o_ref.dtype)


def _vdp_2d(u2, mu):
    """Run the streaming kernel over a lane-dense (rows, C) view (C % 128 == 0)."""
    rows, C = u2.shape
    itemsize = u2.dtype.itemsize
    sub = max(8, 32 // itemsize)  # sublane multiple: 8 f32, 16 bf16, 32 int8

    if rows <= sub:
        tr = rows  # full-extent row block (always legal), single step
    else:
        # Bytes-capped rows per tile (~TARGET_TILE_BYTES per buffer).
        cap = max(sub, (TARGET_TILE_BYTES // (C * itemsize)) // sub * sub)
        # Rows per tile that still yields >= MIN_GRID_STEPS grid steps.
        split = max(sub, _round_up(_cdiv(rows, MIN_GRID_STEPS), sub))
        tr = min(rows, cap, split)

    grid = (_cdiv(rows, tr),)

    # TODO(synk): if callers donate U, input_output_aliases={1: 0} drops the
    # separate output allocation; omitted here so U stays live for checking.
    return pl.pallas_call(
        _vdp_kernel,
        out_shape=jax.ShapeDtypeStruct((rows, C), u2.dtype),
        grid=grid,
        in_specs=[
            pl.BlockSpec(memory_space=pltpu.SMEM),        # mu: scalar param
            pl.BlockSpec((tr, C), lambda i: (i, 0)),      # U tile
        ],
        out_specs=pl.BlockSpec((tr, C), lambda i: (i, 0)),
        compiler_params=pltpu.CompilerParams(
            dimension_semantics=("parallel",),            # shard steps across TCs
            vmem_limit_bytes=VMEM_LIMIT_BYTES,
        ),
    )(mu, u2)


def vdp_forward(U, mu):
    """Pallas implementation of VdP.forward: -mu * (1 - U**2)."""
    orig_shape = U.shape
    orig_dtype = U.dtype
    n = U.size
    flat = U.reshape(-1)

    # Fast path: a lane width that divides n exactly -> zero-copy reshape both ways.
    C = _pick_lane_width(n)
    if C is not None:
        out2 = _vdp_2d(flat.reshape(n // C, C), mu)
        return out2.reshape(orig_shape)

    # Ragged path (n not a multiple of 128): Pallas on the divisible prefix,
    # the < C element tail as one fused jnp expression. No full-array pad/slice.
    C = 512 if n >= 512 else 128
    n_main = (n // C) * C
    if n_main == 0:
        # TODO(synk): sub-128-element inputs are cheaper as a single fused XLA op.
        return (-mu[0] * (1.0 - U * U)).astype(orig_dtype)

    main_out = _vdp_2d(flat[:n_main].reshape(n_main // C, C), mu)
    tail = flat[n_main:]
    tail_out = (-mu[0] * (1.0 - tail * tail)).astype(orig_dtype)
    return jnp.concatenate([main_out.reshape(-1), tail_out]).reshape(orig_shape)


if __name__ == "__main__":
    key = jax.random.PRNGKey(0)
    # Small NCHW-style input consistent with an elementwise forward.
    x = jax.random.normal(key, (2, 4, 16, 16), dtype=jnp.float32)

    # Deterministic parameter init matching nn.Parameter(torch.ones(1)).
    mu = jnp.ones((1,), dtype=jnp.float32)

    out = jax.block_until_ready(vdp_forward(x, mu))
    ref = -mu[0] * (1.0 - x ** 2)
    assert out.shape == x.shape and out.dtype == x.dtype
    assert jnp.allclose(out, ref, atol=1e-6, rtol=1e-6)

    # Medium input: n % 128 == 0, exercises the zero-copy multi-step tiled path.
    y = jax.random.normal(jax.random.PRNGKey(1), (8, 128, 128), dtype=jnp.float32)
    out_y = jax.block_until_ready(vdp_forward(y, mu))
    assert jnp.allclose(out_y, -mu[0] * (1.0 - y ** 2), atol=1e-6, rtol=1e-6)

    # Ragged input (size not a multiple of 128): exercises prefix + jnp-tail path.
    z = jax.random.normal(jax.random.PRNGKey(2), (3, 5, 33, 47), dtype=jnp.float32)
    out_z = jax.block_until_ready(vdp_forward(z, mu))
    assert jnp.allclose(out_z, -mu[0] * (1.0 - z ** 2), atol=1e-6, rtol=1e-6)

    print("KERNEL_OK")
</pallas_src>

<mosaic_0001>
module attributes {stable_mosaic.version = 11 : i64} {
  func.func @_vdp_kernel(%arg0: i32, %arg1: memref<1xf32, #tpu.memory_space<smem>>, %arg2: memref<1x2048xf32, #tpu.memory_space<vmem>>, %arg3: memref<1x2048xf32, #tpu.memory_space<vmem>>) attributes {dimension_semantics = [#tpu.dimension_semantics<parallel>], iteration_bounds = array<i64: 1>, scalar_prefetch = 0 : i64, scratch_operands = 0 : i64, tpu.core_type = #tpu.core_type<tc>, window_params = [{transform_indices = @transform_0, window_bounds = array<i64: 1>}, {transform_indices = @transform_1, window_bounds = array<i64: 1, 2048>}, {transform_indices = @transform_2, window_bounds = array<i64: 1, 2048>}]} {
    %c0 = arith.constant 0 : index
    %0 = memref.load %arg1[%c0] : memref<1xf32, #tpu.memory_space<smem>>
    %c0_0 = arith.constant 0 : index
    %c0_1 = arith.constant 0 : index
    %1 = vector.load %arg2[%c0_0, %c0_1] : memref<1x2048xf32, #tpu.memory_space<vmem>>, vector<1x2048xf32>
    %cst = arith.constant 0.000000e+00 : f32
    %2 = arith.subf %cst, %0 : f32
    %3 = arith.mulf %1, %1 : vector<1x2048xf32>
    %cst_2 = arith.constant 1.000000e+00 : f32
    %4 = vector.broadcast %cst_2 : f32 to vector<1x2048xf32>
    %5 = arith.subf %4, %3 : vector<1x2048xf32>
    %6 = vector.broadcast %2 : f32 to vector<1x2048xf32>
    %7 = arith.mulf %6, %5 : vector<1x2048xf32>
    %c0_3 = arith.constant 0 : index
    %c0_4 = arith.constant 0 : index
    %8 = vector.load %arg3[%c0_3, %c0_4] : memref<1x2048xf32, #tpu.memory_space<vmem>>, vector<1x2048xf32>
    tpu.vector_store %arg3[%c0_3, %c0_4], %7 {strides = array<i32>} : memref<1x2048xf32, #tpu.memory_space<vmem>>, vector<1x2048xf32>,
    return
  }
  func.func @transform_0(%arg0: i32) -> i32 {
    %c0_i32 = arith.constant 0 : i32
    %c0_i32_0 = arith.constant 0 : i32
    return %c0_i32 : i32
  }
  func.func @transform_1(%arg0: i32) -> (i32, i32) {
    %c0_i32 = arith.constant 0 : i32
    %c0_i32_0 = arith.constant 0 : i32
    return %arg0, %c0_i32 : i32, i32
  }
  func.func @transform_2(%arg0: i32) -> (i32, i32) {
    %c0_i32 = arith.constant 0 : i32
    %c0_i32_0 = arith.constant 0 : i32
    return %arg0, %c0_i32 : i32, i32
  }
}

</mosaic_0001>

<bundles_post_ra>
// kernel: tpu_custom_call.1
= control target key start
LH: loop header
LB: loop body
LE: loop exit
PB: predicated region body
PF: predicated region fallthrough
CT: control target
= control target key end

     0   :  { %8 = vsyncpa [#allocation4], 0  ;;  %s125_s0 = inlined_call_operand.<no memory space> [shape: f32[1], index: 0, kind: input, shape index: {}]   ;;  %s126_s1 = inlined_call_operand.hbm [shape: f32[1,2048], index: 1, kind: input, shape index: {}]   ;;  %s127_s2 = inlined_call_operand.hbm [shape: f32[1,2048], index: 2, kind: output, shape index: {}]  }
   0x1   :  { %9 = vsyncpa [#allocation5], 0  ;;  %s99_s9 = smov [#allocation3]  }
   0x2   :  { %s18_s10 = sshll.u32 %s99_s9, 4  ;;  %s19_s10 = int_to_ptr.vmem [resolvable:$true] %s18_s10 }
   0x3   :  { %s63_s11 = scalar_lea.vmem %s19_s10, 256  ;;  %p68_p1 = scmp.lt.s32.totalorder %s19_s10, %s19_s10 }
   0x4   :  { %p64_p0 = scmp.ne.s32.totalorder %s19_s10, %s63_s11  ;;  %p69_p2 = scmp.lt.s32.totalorder %s63_s11, %s63_s11 }
   0x6   :  { %p70_p3 = por %p69_p2, %p68_p1 }
   0x8   :  { %p71_p4 = pnand %p70_p3, %p64_p0 }
   0xa   :  { %74 = shalt.err (!%p71_p4)
}
   0xb   :  { %21 = dma.hbm_to_vmem [thread:$0]  %s126_s1, 256, %s19_s10, [#allocation4]  }
   0xc   :  { %95 = dma.done.wait [#allocation4], 256  }
   0xd   :  { %96 = vsyncadd [#allocation4], 4294967040  ;;  %s28_s16 = ssub.f32 0.0, %s125_s0  ;;  %v26_v0 = vld [vmem:[#allocation3] sm:$0xff]  ;;  %v27_v1 = vld [vmem:[#allocation3 + $0x8] sm:$0xff]  ;;  %s100_s17 = smov [#allocation6]  }
   0xe   :  { %v29_v2 = vmul.f32 %v26_v0, %v26_v0  ;;  %v30_v3 = vmul.f32 %v27_v1, %v27_v1  ;;  %s44_s18 = sshll.u32 %s100_s17, 4  ;;  %s45_s18 = int_to_ptr.vmem [resolvable:$true] %s44_s18 }
   0xf   :  { %v33_v4 = vstv %s28_s16  ;;  %s75_s1 = scalar_lea.vmem %s45_s18, 256  ;;  %p80_p6 = scmp.lt.s32.totalorder %s45_s18, %s45_s18 }
  0x10   :  { %v31_v5 = vsub.f32 1.0, %v29_v2  ;;  %v32_v6 = vsub.f32 1.0, %v30_v3  ;;  %p76_p5 = scmp.ne.s32.totalorder %s45_s18, %s75_s1  ;;  %p81_p7 = scmp.lt.s32.totalorder %s75_s1, %s75_s1 }
  0x12   :  { %v34_v7 = vmul.f32 %v33_v4, %v31_v5  ;;  %v35_v8 = vmul.f32 %v33_v4, %v32_v6  ;;  %p82_p8 = por %p81_p7, %p80_p6 }
  0x14   :  { %36 = vst [vmem:[#allocation6] sm:$0xff] %v34_v7  ;;  %37 = vst [vmem:[#allocation6 + $0x8] sm:$0xff] %v35_v8  ;;  %p83_p9 = pnand %p82_p8, %p76_p5 }
  0x16   :  { %86 = shalt.err (!%p83_p9)
}
  0x17   :  { %47 = dma.vmem_to_hbm [thread:$0]  %s45_s18, 256, %s127_s2, [#allocation5]  }
  0x18   :  { %97 = dma.done.wait [#allocation5], 256  }
  0x19   :  { %98 = vsyncadd [#allocation5], 4294967040 }
  0x1a   :  { %51 = vsyncpa [#allocation4], 1 }
  0x1b   :  { %52 = vsyncpa [#allocation5], 1 }

</bundles_post_ra>
